<compile_context>
chip_gen: v6e
topology: v6e:2x2x1
jax: 0.10.0
libtpu: 0.0.40
codegen_flags: <defaults>
</compile_context>

<pallas_src>
import functools
import numpy as np
import jax
import jax.numpy as jnp
from jax import lax
from jax.experimental import pallas as pl
from jax.experimental.pallas import tpu as pltpu

LANE = 128                      # lane-dense padding for hid / out feature dims
F32 = jnp.float32
BF16 = jnp.bfloat16
VMEM_LIMIT = 32 * 1024 * 1024   # explicit scoped-VMEM budget, safe on v5e/v6e/v7x


def _round_up(x, m):
    return ((x + m - 1) // m) * m


def _prelu(x, a):
    # torch.nn.PReLU with a single shared parameter (default init 0.25)
    return jnp.where(x > 0, x, a * x)


# --------------------------------------------------------------------------
# Kernel 1: node-feature projection  xw = x @ W_n2e          (tiled over nodes)
# --------------------------------------------------------------------------
def proj_kernel(x_ref, w1_ref, xw_ref):
    xw_ref[...] = jnp.dot(
        x_ref[...], w1_ref[...], preferred_element_type=jnp.float32
    ).astype(xw_ref.dtype)


def proj_pallas(x, w1, tn):
    n_pad = x.shape[0]
    return pl.pallas_call(
        proj_kernel,
        out_shape=jax.ShapeDtypeStruct((n_pad, LANE), BF16),
        grid=(n_pad // tn,),
        in_specs=[
            pl.BlockSpec((tn, LANE), lambda i: (i, 0)),      # x tile
            pl.BlockSpec((LANE, LANE), lambda i: (0, 0)),    # W_n2e (padded)
        ],
        out_specs=pl.BlockSpec((tn, LANE), lambda i: (i, 0)),
        compiler_params=pltpu.CompilerParams(
            dimension_semantics=("parallel",),
            vmem_limit_bytes=VMEM_LIMIT),
    )(x, w1)


# --------------------------------------------------------------------------
# Kernel 2: node -> hyperedge aggregation, fused with e @ W_e2n
#   ew[j_tile] = PReLU( de_inv * sum_k H[k_tile, j_tile]^T @ xw[k_tile] ) @ W2
# Grid: (edge tiles [parallel], node tiles [arbitrary reduction]).
# --------------------------------------------------------------------------
def n2e_kernel(h_ref, xw_ref, w2_ref, de_inv_ref, a_ref, ew_ref, acc_ref):
    k = pl.program_id(1)

    @pl.when(k == 0)
    def _():
        acc_ref[...] = jnp.zeros_like(acc_ref)

    # Contract H's node (sublane) axis directly -- no H^T materialization.
    acc_ref[...] += lax.dot_general(
        h_ref[...], xw_ref[...],
        dimension_numbers=(((0,), (0,)), ((), ())),
        preferred_element_type=jnp.float32)

    @pl.when(k == pl.num_programs(1) - 1)
    def _():
        a = a_ref[0]
        e = _prelu(acc_ref[...] * de_inv_ref[...], a)   # conv's PReLU on edges
        # bias_n2e is reset to zero, dropout p=0 -> no-ops
        ew_ref[...] = jnp.dot(
            e, w2_ref[...], preferred_element_type=jnp.float32
        ).astype(ew_ref.dtype)


def n2e_pallas(h, xw, w2, de_inv, a, tn, te):
    n_pad, m_pad = h.shape
    return pl.pallas_call(
        n2e_kernel,
        out_shape=jax.ShapeDtypeStruct((m_pad, LANE), BF16),
        grid=(m_pad // te, n_pad // tn),
        in_specs=[
            pl.BlockSpec((tn, te), lambda j, k: (k, j)),        # H (bf16)
            pl.BlockSpec((tn, LANE), lambda j, k: (k, 0)),      # xw (bf16)
            pl.BlockSpec((LANE, LANE), lambda j, k: (0, 0)),    # W_e2n (padded)
            pl.BlockSpec((te, 1), lambda j, k: (j, 0)),         # de_inv
            pl.BlockSpec(memory_space=pltpu.MemorySpace.SMEM),  # PReLU slope
        ],
        out_specs=pl.BlockSpec((te, LANE), lambda j, k: (j, 0)),
        scratch_shapes=[pltpu.VMEM((te, LANE), jnp.float32)],
        compiler_params=pltpu.CompilerParams(
            dimension_semantics=("parallel", "arbitrary"),
            vmem_limit_bytes=VMEM_LIMIT),
    )(h, xw, w2, de_inv, a)


# --------------------------------------------------------------------------
# Kernel 3: hyperedge -> node aggregation + analytic self-loop + outer PReLU
#   y[i_tile] = PReLU( dn_inv * ( sum_k H[i_tile, k_tile] @ ew[k_tile]
#                                 + PReLU(xw[i_tile]) @ W2 ) )
# Grid: (node tiles [parallel], edge tiles [arbitrary reduction]).
# --------------------------------------------------------------------------
def e2n_kernel(h_ref, ew_ref, xw_ref, w2_ref, dn_inv_ref, a_ref, y_ref, acc_ref):
    k = pl.program_id(1)

    @pl.when(k == 0)
    def _():
        acc_ref[...] = jnp.zeros_like(acc_ref)

    acc_ref[...] += jnp.dot(h_ref[...], ew_ref[...],
                            preferred_element_type=jnp.float32)

    @pl.when(k == pl.num_programs(1) - 1)
    def _():
        a = a_ref[0]
        # Self-loop hyperedges (H_full = [H_edges | I_N]) handled analytically:
        # each node's own hyperedge has degree 1, so e_self = PReLU(xw) and its
        # edge->node contribution is e_self @ W_e2n (dn already counts the +1).
        e_self = _prelu(xw_ref[...].astype(jnp.float32), a)
        ew_self = jnp.dot(e_self, w2_ref[...], preferred_element_type=jnp.float32)
        n = (acc_ref[...] + ew_self) * dn_inv_ref[...]
        # bias_e2n is reset to zero -> no add
        y_ref[...] = _prelu(n, a)                      # HyperEncoder's outer PReLU


def e2n_pallas(h, ew, xw, w2, dn_inv, a, tn, te):
    n_pad, m_pad = h.shape
    return pl.pallas_call(
        e2n_kernel,
        out_shape=jax.ShapeDtypeStruct((n_pad, LANE), F32),
        grid=(n_pad // tn, m_pad // te),
        in_specs=[
            pl.BlockSpec((tn, te), lambda i, k: (i, k)),        # H (bf16)
            pl.BlockSpec((te, LANE), lambda i, k: (k, 0)),      # ew (bf16)
            pl.BlockSpec((tn, LANE), lambda i, k: (i, 0)),      # xw (bf16)
            pl.BlockSpec((LANE, LANE), lambda i, k: (0, 0)),    # W_e2n (padded)
            pl.BlockSpec((tn, 1), lambda i, k: (i, 0)),         # dn_inv
            pl.BlockSpec(memory_space=pltpu.MemorySpace.SMEM),  # PReLU slope
        ],
        out_specs=pl.BlockSpec((tn, LANE), lambda i, k: (i, 0)),
        scratch_shapes=[pltpu.VMEM((tn, LANE), jnp.float32)],
        compiler_params=pltpu.CompilerParams(
            dimension_semantics=("parallel", "arbitrary"),
            vmem_limit_bytes=VMEM_LIMIT),
    )(h, ew, xw, w2, dn_inv, a)


# --------------------------------------------------------------------------
# Glue / wrapper
# --------------------------------------------------------------------------
def glorot(key, fan_in, fan_out):
    limit = float(np.sqrt(6.0 / (fan_in + fan_out)))
    return jax.random.uniform(key, (fan_in, fan_out), jnp.float32, -limit, limit)


def hypercl_forward(x, hyperedge_index, params, num_nodes, num_edges,
                    tn_target=512, te_target=1024):
    """hyperCL.forward: self-loops handled analytically, dense H only for real
    hyperedges, degrees precomputed once, per-layer [proj -> n2e -> e2n]."""
    N, F = x.shape
    M = num_edges
    assert F <= LANE, "in_dim must fit in one 128-lane block"

    # Dense incidence of the *real* hyperedges only (0/1, exact in bf16).
    # NOTE: .at[...].set(1.0) de-duplicates repeated (node, edge) pairs, while
    # torch scatter_add would count them; identical for duplicate-free inputs.
    H = jnp.zeros((N, M), jnp.float32).at[
        hyperedge_index[0], hyperedge_index[1]].set(1.0)

    # Precomputed degrees (self-loop adds +1 to every node; self-loop edges
    # have degree exactly 1, handled inside the e2n kernel).
    dn = H.sum(axis=1, keepdims=True) + 1.0          # [N, 1], always >= 1
    de = H.sum(axis=0, keepdims=True).T              # [M, 1]
    dn_inv = 1.0 / dn
    de_inv = jnp.where(de > 0, 1.0 / de, 0.0)

    # Tile sizes: 512 node rows / 1024 edge cols when the graph is large
    # (amortizes per-step overhead; cuts xw/ew re-read traffic to <=25% of the
    # H stream), otherwise the (8,128)-aligned full extent.  Padding rows/cols
    # are zero and cannot contaminate real outputs (zero incidence, zero
    # de_inv, zero dn_inv).
    tn = min(tn_target, _round_up(N, 8))
    te = min(te_target, _round_up(M, LANE))
    n_pad = _round_up(N, tn)
    m_pad = _round_up(M, te)

    H_p = jnp.zeros((n_pad, m_pad), BF16).at[:N, :M].set(H.astype(BF16))
    x_p = jnp.zeros((n_pad, LANE), F32).at[:N, :F].set(x)
    dn_inv_p = jnp.zeros((n_pad, 1), F32).at[:N].set(dn_inv)
    de_inv_p = jnp.zeros((m_pad, 1), F32).at[:M].set(de_inv)
    a = jnp.full((1,), params["prelu"], F32)         # shared PReLU slope (SMEM)

    def pad_w(w):   # lane-dense weights: embed into a 128x128 zero block
        assert w.shape[0] <= LANE and w.shape[1] <= LANE
        return jnp.zeros((LANE, LANE), F32).at[:w.shape[0], :w.shape[1]].set(w)

    h = x_p
    out_dim = params["convs"][-1][1].shape[1]
    for (w1, w2) in params["convs"]:
        w1_p, w2_p = pad_w(w1), pad_w(w2)
        xw = proj_pallas(h, w1_p, tn)                           # [n_pad,128] bf16
        ew = n2e_pallas(H_p, xw, w2_p, de_inv_p, a, tn, te)     # [m_pad,128] bf16
        h = e2n_pallas(H_p, ew, xw, w2_p, dn_inv_p, a, tn, te)  # [n_pad,128] f32
    return h[:N, :out_dim]


def reference_forward(x, hyperedge_index, params, num_nodes, num_edges):
    """Pure-JAX float32 reference with the explicit self-loop incidence."""
    node_idx = jnp.arange(num_nodes, dtype=jnp.int32)
    edge_idx = jnp.arange(num_edges, num_edges + num_nodes, dtype=jnp.int32)
    full_index = jnp.concatenate(
        [hyperedge_index, jnp.stack([node_idx, edge_idx])], axis=1)
    m_total = num_edges + num_nodes
    H = jnp.zeros((num_nodes, m_total), jnp.float32).at[
        full_index[0], full_index[1]].set(1.0)
    dn = H.sum(1, keepdims=True)
    de = H.sum(0, keepdims=True).T
    dn_inv = jnp.where(dn > 0, 1.0 / dn, 0.0)
    de_inv = jnp.where(de > 0, 1.0 / de, 0.0)
    a = params["prelu"]
    h = x
    for (w1, w2) in params["convs"]:
        e = _prelu((H.T @ (h @ w1)) * de_inv, a)
        h = _prelu((H @ (e @ w2)) * dn_inv, a)
    return h


if __name__ == "__main__":
    # Small shapes consistent with the module: 8 nodes, 4 hyperedges,
    # in_dim=16, edge_dim (hidden)=32, node_dim (output)=32, num_layers=2.
    num_nodes, num_edges = 8, 4
    in_dim, edge_dim, node_dim = 16, 32, 32

    key = jax.random.PRNGKey(0)
    k_x, k1, k2, k3, k4 = jax.random.split(key, 5)

    x = jax.random.normal(k_x, (num_nodes, in_dim), jnp.float32)
    # deterministic hypergraph: 4 hyperedges of 3 nodes each (no duplicates)
    hyperedge_index = jnp.array(
        [[0, 1, 2, 2, 3, 4, 4, 5, 6, 6, 7, 0],
         [0, 0, 0, 1, 1, 1, 2, 2, 2, 3, 3, 3]], dtype=jnp.int32)

    params = {
        "prelu": 0.25,  # torch.nn.PReLU default (shared across convs + encoder)
        "convs": [
            (glorot(k1, in_dim, edge_dim),   glorot(k2, edge_dim, node_dim)),
            (glorot(k3, node_dim, edge_dim), glorot(k4, edge_dim, node_dim)),
        ],
    }
    # TODO(synk): projection heads (fc*_n/e), nn.Bilinear disc and the CL losses
    # are not part of hyperCL.forward and are not implemented here.

    fwd = jax.jit(
        hypercl_forward,
        static_argnames=("num_nodes", "num_edges", "tn_target", "te_target"))
    out = fwd(x, hyperedge_index, params,
              num_nodes=num_nodes, num_edges=num_edges)
    out = jax.block_until_ready(out)

    ref = reference_forward(x, hyperedge_index, params, num_nodes, num_edges)
    # bf16 storage of H/xw/ew (f32 accumulation) -> tolerance widened to 2e-2.
    np.testing.assert_allclose(np.asarray(out), np.asarray(ref),
                               atol=2e-2, rtol=2e-2)

    print("KERNEL_OK")
</pallas_src>

<mosaic_0001>
module attributes {stable_mosaic.version = 11 : i64} {
  func.func @proj_kernel(%arg0: i32, %arg1: memref<8x128xf32, #tpu.memory_space<vmem>>, %arg2: memref<128x128xf32, #tpu.memory_space<vmem>>, %arg3: memref<8x128xbf16, #tpu.memory_space<vmem>>) attributes {dimension_semantics = [#tpu.dimension_semantics<parallel>], iteration_bounds = array<i64: 1>, scalar_prefetch = 0 : i64, scratch_operands = 0 : i64, tpu.core_type = #tpu.core_type<tc>, window_params = [{transform_indices = @transform_0, window_bounds = array<i64: 8, 128>}, {pipeline_mode = #tpu.pipeline_mode<synchronous>, transform_indices = @transform_1, window_bounds = array<i64: 128, 128>}, {transform_indices = @transform_2, window_bounds = array<i64: 8, 128>}]} {
    %c0 = arith.constant 0 : index
    %c0_0 = arith.constant 0 : index
    %0 = vector.load %arg1[%c0, %c0_0] : memref<8x128xf32, #tpu.memory_space<vmem>>, vector<8x128xf32>
    %c0_1 = arith.constant 0 : index
    %c0_2 = arith.constant 0 : index
    %1 = vector.load %arg2[%c0_1, %c0_2] : memref<128x128xf32, #tpu.memory_space<vmem>>, vector<128x128xf32>
    %cst = arith.constant dense<0.000000e+00> : vector<8x128xf32>
    %2 = tpu.matmul %0, %1, %cst {dimension_numbers = #tpu.dot_dimension_numbers<[1], [0], [0], [1], [0, 0, 1, 1], [], []>} : vector<8x128xf32>, vector<128x128xf32>, vector<8x128xf32> -> vector<8x128xf32>
    %3 = arith.truncf %2 : vector<8x128xf32> to vector<8x128xbf16>
    %c0_3 = arith.constant 0 : index
    %c0_4 = arith.constant 0 : index
    %4 = vector.load %arg3[%c0_3, %c0_4] : memref<8x128xbf16, #tpu.memory_space<vmem>>, vector<8x128xbf16>
    tpu.vector_store %arg3[%c0_3, %c0_4], %3 {strides = array<i32>} : memref<8x128xbf16, #tpu.memory_space<vmem>>, vector<8x128xbf16>,
    return
  }
  func.func @transform_0(%arg0: i32) -> (i32, i32) {
    %c0_i32 = arith.constant 0 : i32
    %c0_i32_0 = arith.constant 0 : i32
    return %arg0, %c0_i32 : i32, i32
  }
  func.func @transform_1(%arg0: i32) -> (i32, i32) {
    %c0_i32 = arith.constant 0 : i32
    %c0_i32_0 = arith.constant 0 : i32
    %c0_i32_1 = arith.constant 0 : i32
    return %c0_i32, %c0_i32_0 : i32, i32
  }
  func.func @transform_2(%arg0: i32) -> (i32, i32) {
    %c0_i32 = arith.constant 0 : i32
    %c0_i32_0 = arith.constant 0 : i32
    return %arg0, %c0_i32 : i32, i32
  }
}

module attributes {stable_mosaic.version = 11 : i64} {
  func.func @n2e_kernel(%arg0: i32, %arg1: i32, %arg2: memref<8x128xbf16, #tpu.memory_space<vmem>>, %arg3: memref<8x128xbf16, #tpu.memory_space<vmem>>, %arg4: memref<128x128xf32, #tpu.memory_space<vmem>>, %arg5: memref<128x1xf32, #tpu.memory_space<vmem>>, %arg6: memref<1xf32, #tpu.memory_space<smem>>, %arg7: memref<128x128xbf16, #tpu.memory_space<vmem>>, %arg8: memref<128x128xf32, #tpu.memory_space<vmem>>) attributes {dimension_semantics = [#tpu.dimension_semantics<parallel>, #tpu.dimension_semantics<arbitrary>], iteration_bounds = array<i64: 1, 1>, scalar_prefetch = 0 : i64, scratch_operands = 1 : i64, tpu.core_type = #tpu.core_type<tc>, window_params = [{transform_indices = @transform_0, window_bounds = array<i64: 8, 128>}, {transform_indices = @transform_1, window_bounds = array<i64: 8, 128>}, {pipeline_mode = #tpu.pipeline_mode<synchronous>, transform_indices = @transform_2, window_bounds = array<i64: 128, 128>}, {transform_indices = @transform_3, window_bounds = array<i64: 128, 1>}, {transform_indices = @transform_4, window_bounds = array<i64: 1>}, {transform_indices = @transform_5, window_bounds = array<i64: 128, 128>}]} {
    %c0_i32 = arith.constant 0 : i32
    %0 = arith.cmpi eq, %arg1, %c0_i32 : i32
    %1 = arith.extui %0 : i1 to i32
    %c0_i32_0 = arith.constant 0 : i32
    %2 = arith.cmpi ne, %1, %c0_i32_0 : i32
    scf.if %2 {
      %cst_10 = arith.constant 0.000000e+00 : f32
      %12 = vector.broadcast %cst_10 : f32 to vector<128x128xf32>
      %c0_11 = arith.constant 0 : index
      %c0_12 = arith.constant 0 : index
      %13 = vector.load %arg8[%c0_11, %c0_12] : memref<128x128xf32, #tpu.memory_space<vmem>>, vector<128x128xf32>
      tpu.vector_store %arg8[%c0_11, %c0_12], %12 {strides = array<i32>} : memref<128x128xf32, #tpu.memory_space<vmem>>, vector<128x128xf32>,
    } else {
    }
    %c0 = arith.constant 0 : index
    %c0_1 = arith.constant 0 : index
    %3 = vector.load %arg8[%c0, %c0_1] : memref<128x128xf32, #tpu.memory_space<vmem>>, vector<128x128xf32>
    %c0_2 = arith.constant 0 : index
    %c0_3 = arith.constant 0 : index
    %4 = vector.load %arg2[%c0_2, %c0_3] : memref<8x128xbf16, #tpu.memory_space<vmem>>, vector<8x128xbf16>
    %c0_4 = arith.constant 0 : index
    %c0_5 = arith.constant 0 : index
    %5 = vector.load %arg3[%c0_4, %c0_5] : memref<8x128xbf16, #tpu.memory_space<vmem>>, vector<8x128xbf16>
    %cst = arith.constant dense<0.000000e+00> : vector<128x128xf32>
    %6 = tpu.matmul %4, %5, %cst {dimension_numbers = #tpu.dot_dimension_numbers<[0], [0], [1], [1], [0, 1, 1, 1], [], []>} : vector<8x128xbf16>, vector<8x128xbf16>, vector<128x128xf32> -> vector<128x128xf32>
    %7 = arith.addf %3, %6 : vector<128x128xf32>
    %c0_6 = arith.constant 0 : index
    %c0_7 = arith.constant 0 : index
    %8 = vector.load %arg8[%c0_6, %c0_7] : memref<128x128xf32, #tpu.memory_space<vmem>>, vector<128x128xf32>
    tpu.vector_store %arg8[%c0_6, %c0_7], %7 {strides = array<i32>} : memref<128x128xf32, #tpu.memory_space<vmem>>, vector<128x128xf32>,
    %c0_i32_8 = arith.constant 0 : i32
    %9 = arith.cmpi eq, %arg1, %c0_i32_8 : i32
    %10 = arith.extui %9 : i1 to i32
    %c0_i32_9 = arith.constant 0 : i32
    %11 = arith.cmpi ne, %10, %c0_i32_9 : i32
    scf.if %11 {
      %c0_10 = arith.constant 0 : index
      %12 = memref.load %arg6[%c0_10] : memref<1xf32, #tpu.memory_space<smem>>
      %c0_11 = arith.constant 0 : index
      %c0_12 = arith.constant 0 : index
      %13 = vector.load %arg8[%c0_11, %c0_12] : memref<128x128xf32, #tpu.memory_space<vmem>>, vector<128x128xf32>
      %c0_13 = arith.constant 0 : index
      %c0_14 = arith.constant 0 : index
      %14 = vector.load %arg5[%c0_13, %c0_14] : memref<128x1xf32, #tpu.memory_space<vmem>>, vector<128x1xf32>
      %15 = vector.broadcast %14 : vector<128x1xf32> to vector<128x128xf32>
      %16 = arith.mulf %13, %15 : vector<128x128xf32>
      %cst_15 = arith.constant 0.000000e+00 : f32
      %17 = vector.broadcast %cst_15 : f32 to vector<128x128xf32>
      %18 = arith.cmpf ogt, %16, %17 : vector<128x128xf32>
      %19 = vector.broadcast %12 : f32 to vector<128x128xf32>
      %20 = arith.mulf %19, %16 : vector<128x128xf32>
      %21 = arith.select %18, %16, %20 : vector<128x128xi1>, vector<128x128xf32>
      %c0_16 = arith.constant 0 : index
      %c0_17 = arith.constant 0 : index
      %22 = vector.load %arg4[%c0_16, %c0_17] : memref<128x128xf32, #tpu.memory_space<vmem>>, vector<128x128xf32>
      %cst_18 = arith.constant dense<0.000000e+00> : vector<128x128xf32>
      %23 = tpu.matmul %21, %22, %cst_18 {dimension_numbers = #tpu.dot_dimension_numbers<[1], [0], [0], [1], [0, 0, 1, 1], [], []>} : vector<128x128xf32>, vector<128x128xf32>, vector<128x128xf32> -> vector<128x128xf32>
      %24 = arith.truncf %23 : vector<128x128xf32> to vector<128x128xbf16>
      %c0_19 = arith.constant 0 : index
      %c0_20 = arith.constant 0 : index
      %25 = vector.load %arg7[%c0_19, %c0_20] : memref<128x128xbf16, #tpu.memory_space<vmem>>, vector<128x128xbf16>
      tpu.vector_store %arg7[%c0_19, %c0_20], %24 {strides = array<i32>} : memref<128x128xbf16, #tpu.memory_space<vmem>>, vector<128x128xbf16>,
    } else {
    }
    return
  }
  func.func @transform_0(%arg0: i32, %arg1: i32) -> (i32, i32) {
    %c0_i32 = arith.constant 0 : i32
    return %arg1, %arg0 : i32, i32
  }
  func.func @transform_1(%arg0: i32, %arg1: i32) -> (i32, i32) {
    %c0_i32 = arith.constant 0 : i32
    %c0_i32_0 = arith.constant 0 : i32
    return %arg1, %c0_i32 : i32, i32
  }
  func.func @transform_2(%arg0: i32, %arg1: i32) -> (i32, i32) {
    %c0_i32 = arith.constant 0 : i32
    %c0_i32_0 = arith.constant 0 : i32
    %c0_i32_1 = arith.constant 0 : i32
    return %c0_i32, %c0_i32_0 : i32, i32
  }
  func.func @transform_3(%arg0: i32, %arg1: i32) -> (i32, i32) {
    %c0_i32 = arith.constant 0 : i32
    %c0_i32_0 = arith.constant 0 : i32
    return %arg0, %c0_i32 : i32, i32
  }
  func.func @transform_4(%arg0: i32, %arg1: i32) -> i32 {
    %c0_i32 = arith.constant 0 : i32
    %c0_i32_0 = arith.constant 0 : i32
    return %c0_i32 : i32
  }
  func.func @transform_5(%arg0: i32, %arg1: i32) -> (i32, i32) {
    %c0_i32 = arith.constant 0 : i32
    %c0_i32_0 = arith.constant 0 : i32
    return %arg0, %c0_i32 : i32, i32
  }
}

module attributes {stable_mosaic.version = 11 : i64} {
  func.func @e2n_kernel(%arg0: i32, %arg1: i32, %arg2: memref<8x128xbf16, #tpu.memory_space<vmem>>, %arg3: memref<128x128xbf16, #tpu.memory_space<vmem>>, %arg4: memref<8x128xbf16, #tpu.memory_space<vmem>>, %arg5: memref<128x128xf32, #tpu.memory_space<vmem>>, %arg6: memref<8x1xf32, #tpu.memory_space<vmem>>, %arg7: memref<1xf32, #tpu.memory_space<smem>>, %arg8: memref<8x128xf32, #tpu.memory_space<vmem>>, %arg9: memref<8x128xf32, #tpu.memory_space<vmem>>) attributes {dimension_semantics = [#tpu.dimension_semantics<parallel>, #tpu.dimension_semantics<arbitrary>], iteration_bounds = array<i64: 1, 1>, scalar_prefetch = 0 : i64, scratch_operands = 1 : i64, tpu.core_type = #tpu.core_type<tc>, window_params = [{transform_indices = @transform_0, window_bounds = array<i64: 8, 128>}, {transform_indices = @transform_1, window_bounds = array<i64: 128, 128>}, {transform_indices = @transform_2, window_bounds = array<i64: 8, 128>}, {pipeline_mode = #tpu.pipeline_mode<synchronous>, transform_indices = @transform_3, window_bounds = array<i64: 128, 128>}, {transform_indices = @transform_4, window_bounds = array<i64: 8, 1>}, {transform_indices = @transform_5, window_bounds = array<i64: 1>}, {transform_indices = @transform_6, window_bounds = array<i64: 8, 128>}]} {
    %c0_i32 = arith.constant 0 : i32
    %0 = arith.cmpi eq, %arg1, %c0_i32 : i32
    %1 = arith.extui %0 : i1 to i32
    %c0_i32_0 = arith.constant 0 : i32
    %2 = arith.cmpi ne, %1, %c0_i32_0 : i32
    scf.if %2 {
      %cst_10 = arith.constant 0.000000e+00 : f32
      %12 = vector.broadcast %cst_10 : f32 to vector<8x128xf32>
      %c0_11 = arith.constant 0 : index
      %c0_12 = arith.constant 0 : index
      %13 = vector.load %arg9[%c0_11, %c0_12] : memref<8x128xf32, #tpu.memory_space<vmem>>, vector<8x128xf32>
      tpu.vector_store %arg9[%c0_11, %c0_12], %12 {strides = array<i32>} : memref<8x128xf32, #tpu.memory_space<vmem>>, vector<8x128xf32>,
    } else {
    }
    %c0 = arith.constant 0 : index
    %c0_1 = arith.constant 0 : index
    %3 = vector.load %arg9[%c0, %c0_1] : memref<8x128xf32, #tpu.memory_space<vmem>>, vector<8x128xf32>
    %c0_2 = arith.constant 0 : index
    %c0_3 = arith.constant 0 : index
    %4 = vector.load %arg2[%c0_2, %c0_3] : memref<8x128xbf16, #tpu.memory_space<vmem>>, vector<8x128xbf16>
    %c0_4 = arith.constant 0 : index
    %c0_5 = arith.constant 0 : index
    %5 = vector.load %arg3[%c0_4, %c0_5] : memref<128x128xbf16, #tpu.memory_space<vmem>>, vector<128x128xbf16>
    %cst = arith.constant dense<0.000000e+00> : vector<8x128xf32>
    %6 = tpu.matmul %4, %5, %cst {dimension_numbers = #tpu.dot_dimension_numbers<[1], [0], [0], [1], [0, 0, 1, 1], [], []>} : vector<8x128xbf16>, vector<128x128xbf16>, vector<8x128xf32> -> vector<8x128xf32>
    %7 = arith.addf %3, %6 : vector<8x128xf32>
    %c0_6 = arith.constant 0 : index
    %c0_7 = arith.constant 0 : index
    %8 = vector.load %arg9[%c0_6, %c0_7] : memref<8x128xf32, #tpu.memory_space<vmem>>, vector<8x128xf32>
    tpu.vector_store %arg9[%c0_6, %c0_7], %7 {strides = array<i32>} : memref<8x128xf32, #tpu.memory_space<vmem>>, vector<8x128xf32>,
    %c0_i32_8 = arith.constant 0 : i32
    %9 = arith.cmpi eq, %arg1, %c0_i32_8 : i32
    %10 = arith.extui %9 : i1 to i32
    %c0_i32_9 = arith.constant 0 : i32
    %11 = arith.cmpi ne, %10, %c0_i32_9 : i32
    scf.if %11 {
      %c0_10 = arith.constant 0 : index
      %12 = memref.load %arg7[%c0_10] : memref<1xf32, #tpu.memory_space<smem>>
      %c0_11 = arith.constant 0 : index
      %c0_12 = arith.constant 0 : index
      %13 = vector.load %arg4[%c0_11, %c0_12] : memref<8x128xbf16, #tpu.memory_space<vmem>>, vector<8x128xbf16>
      %14 = arith.extf %13 : vector<8x128xbf16> to vector<8x128xf32>
      %cst_13 = arith.constant 0.000000e+00 : f32
      %15 = vector.broadcast %cst_13 : f32 to vector<8x128xf32>
      %16 = arith.cmpf ogt, %14, %15 : vector<8x128xf32>
      %17 = vector.broadcast %12 : f32 to vector<8x128xf32>
      %18 = arith.mulf %17, %14 : vector<8x128xf32>
      %19 = arith.select %16, %14, %18 : vector<8x128xi1>, vector<8x128xf32>
      %c0_14 = arith.constant 0 : index
      %c0_15 = arith.constant 0 : index
      %20 = vector.load %arg5[%c0_14, %c0_15] : memref<128x128xf32, #tpu.memory_space<vmem>>, vector<128x128xf32>
      %cst_16 = arith.constant dense<0.000000e+00> : vector<8x128xf32>
      %21 = tpu.matmul %19, %20, %cst_16 {dimension_numbers = #tpu.dot_dimension_numbers<[1], [0], [0], [1], [0, 0, 1, 1], [], []>} : vector<8x128xf32>, vector<128x128xf32>, vector<8x128xf32> -> vector<8x128xf32>
      %c0_17 = arith.constant 0 : index
      %c0_18 = arith.constant 0 : index
      %22 = vector.load %arg9[%c0_17, %c0_18] : memref<8x128xf32, #tpu.memory_space<vmem>>, vector<8x128xf32>
      %23 = arith.addf %22, %21 : vector<8x128xf32>
      %c0_19 = arith.constant 0 : index
      %c0_20 = arith.constant 0 : index
      %24 = vector.load %arg6[%c0_19, %c0_20] : memref<8x1xf32, #tpu.memory_space<vmem>>, vector<8x1xf32>
      %25 = vector.broadcast %24 : vector<8x1xf32> to vector<8x128xf32>
      %26 = arith.mulf %23, %25 : vector<8x128xf32>
      %cst_21 = arith.constant 0.000000e+00 : f32
      %27 = vector.broadcast %cst_21 : f32 to vector<8x128xf32>
      %28 = arith.cmpf ogt, %26, %27 : vector<8x128xf32>
      %29 = vector.broadcast %12 : f32 to vector<8x128xf32>
      %30 = arith.mulf %29, %26 : vector<8x128xf32>
      %31 = arith.select %28, %26, %30 : vector<8x128xi1>, vector<8x128xf32>
      %c0_22 = arith.constant 0 : index
      %c0_23 = arith.constant 0 : index
      %32 = vector.load %arg8[%c0_22, %c0_23] : memref<8x128xf32, #tpu.memory_space<vmem>>, vector<8x128xf32>
      tpu.vector_store %arg8[%c0_22, %c0_23], %31 {strides = array<i32>} : memref<8x128xf32, #tpu.memory_space<vmem>>, vector<8x128xf32>,
    } else {
    }
    return
  }
  func.func @transform_0(%arg0: i32, %arg1: i32) -> (i32, i32) {
    %c0_i32 = arith.constant 0 : i32
    return %arg0, %arg1 : i32, i32
  }
  func.func @transform_1(%arg0: i32, %arg1: i32) -> (i32, i32) {
    %c0_i32 = arith.constant 0 : i32
    %c0_i32_0 = arith.constant 0 : i32
    return %arg1, %c0_i32 : i32, i32
  }
  func.func @transform_2(%arg0: i32, %arg1: i32) -> (i32, i32) {
    %c0_i32 = arith.constant 0 : i32
    %c0_i32_0 = arith.constant 0 : i32
    return %arg0, %c0_i32 : i32, i32
  }
  func.func @transform_3(%arg0: i32, %arg1: i32) -> (i32, i32) {
    %c0_i32 = arith.constant 0 : i32
    %c0_i32_0 = arith.constant 0 : i32
    %c0_i32_1 = arith.constant 0 : i32
    return %c0_i32, %c0_i32_0 : i32, i32
  }
  func.func @transform_4(%arg0: i32, %arg1: i32) -> (i32, i32) {
    %c0_i32 = arith.constant 0 : i32
    %c0_i32_0 = arith.constant 0 : i32
    return %arg0, %c0_i32 : i32, i32
  }
  func.func @transform_5(%arg0: i32, %arg1: i32) -> i32 {
    %c0_i32 = arith.constant 0 : i32
    %c0_i32_0 = arith.constant 0 : i32
    return %c0_i32 : i32
  }
  func.func @transform_6(%arg0: i32, %arg1: i32) -> (i32, i32) {
    %c0_i32 = arith.constant 0 : i32
    %c0_i32_0 = arith.constant 0 : i32
    return %arg0, %c0_i32 : i32, i32
  }
}

module attributes {stable_mosaic.version = 11 : i64} {
  func.func @e2n_kernel(%arg0: i32, %arg1: i32, %arg2: memref<8x128xbf16, #tpu.memory_space<vmem>>, %arg3: memref<128x128xbf16, #tpu.memory_space<vmem>>, %arg4: memref<8x128xbf16, #tpu.memory_space<vmem>>, %arg5: memref<128x128xf32, #tpu.memory_space<vmem>>, %arg6: memref<8x1xf32, #tpu.memory_space<vmem>>, %arg7: memref<1xf32, #tpu.memory_space<smem>>, %arg8: memref<8x128xf32, #tpu.memory_space<vmem>>, %arg9: memref<8x128xf32, #tpu.memory_space<vmem>>) attributes {dimension_semantics = [#tpu.dimension_semantics<parallel>, #tpu.dimension_semantics<arbitrary>], iteration_bounds = array<i64: 1, 1>, scalar_prefetch = 0 : i64, scratch_operands = 1 : i64, tpu.core_type = #tpu.core_type<tc>, window_params = [{transform_indices = @transform_0, window_bounds = array<i64: 8, 128>}, {transform_indices = @transform_1, window_bounds = array<i64: 128, 128>}, {transform_indices = @transform_2, window_bounds = array<i64: 8, 128>}, {pipeline_mode = #tpu.pipeline_mode<synchronous>, transform_indices = @transform_3, window_bounds = array<i64: 128, 128>}, {transform_indices = @transform_4, window_bounds = array<i64: 8, 1>}, {transform_indices = @transform_5, window_bounds = array<i64: 1>}, {transform_indices = @transform_6, window_bounds = array<i64: 8, 128>}]} {
    %c0_i32 = arith.constant 0 : i32
    %0 = arith.cmpi eq, %arg1, %c0_i32 : i32
    %1 = arith.extui %0 : i1 to i32
    %c0_i32_0 = arith.constant 0 : i32
    %2 = arith.cmpi ne, %1, %c0_i32_0 : i32
    scf.if %2 {
      %cst_10 = arith.constant 0.000000e+00 : f32
      %12 = vector.broadcast %cst_10 : f32 to vector<8x128xf32>
      %c0_11 = arith.constant 0 : index
      %c0_12 = arith.constant 0 : index
      %13 = vector.load %arg9[%c0_11, %c0_12] : memref<8x128xf32, #tpu.memory_space<vmem>>, vector<8x128xf32>
      tpu.vector_store %arg9[%c0_11, %c0_12], %12 {strides = array<i32>} : memref<8x128xf32, #tpu.memory_space<vmem>>, vector<8x128xf32>,
    } else {
    }
    %c0 = arith.constant 0 : index
    %c0_1 = arith.constant 0 : index
    %3 = vector.load %arg9[%c0, %c0_1] : memref<8x128xf32, #tpu.memory_space<vmem>>, vector<8x128xf32>
    %c0_2 = arith.constant 0 : index
    %c0_3 = arith.constant 0 : index
    %4 = vector.load %arg2[%c0_2, %c0_3] : memref<8x128xbf16, #tpu.memory_space<vmem>>, vector<8x128xbf16>
    %c0_4 = arith.constant 0 : index
    %c0_5 = arith.constant 0 : index
    %5 = vector.load %arg3[%c0_4, %c0_5] : memref<128x128xbf16, #tpu.memory_space<vmem>>, vector<128x128xbf16>
    %cst = arith.constant dense<0.000000e+00> : vector<8x128xf32>
    %6 = tpu.matmul %4, %5, %cst {dimension_numbers = #tpu.dot_dimension_numbers<[1], [0], [0], [1], [0, 0, 1, 1], [], []>} : vector<8x128xbf16>, vector<128x128xbf16>, vector<8x128xf32> -> vector<8x128xf32>
    %7 = arith.addf %3, %6 : vector<8x128xf32>
    %c0_6 = arith.constant 0 : index
    %c0_7 = arith.constant 0 : index
    %8 = vector.load %arg9[%c0_6, %c0_7] : memref<8x128xf32, #tpu.memory_space<vmem>>, vector<8x128xf32>
    tpu.vector_store %arg9[%c0_6, %c0_7], %7 {strides = array<i32>} : memref<8x128xf32, #tpu.memory_space<vmem>>, vector<8x128xf32>,
    %c0_i32_8 = arith.constant 0 : i32
    %9 = arith.cmpi eq, %arg1, %c0_i32_8 : i32
    %10 = arith.extui %9 : i1 to i32
    %c0_i32_9 = arith.constant 0 : i32
    %11 = arith.cmpi ne, %10, %c0_i32_9 : i32
    scf.if %11 {
      %c0_10 = arith.constant 0 : index
      %12 = memref.load %arg7[%c0_10] : memref<1xf32, #tpu.memory_space<smem>>
      %c0_11 = arith.constant 0 : index
      %c0_12 = arith.constant 0 : index
      %13 = vector.load %arg4[%c0_11, %c0_12] : memref<8x128xbf16, #tpu.memory_space<vmem>>, vector<8x128xbf16>
      %14 = arith.extf %13 : vector<8x128xbf16> to vector<8x128xf32>
      %cst_13 = arith.constant 0.000000e+00 : f32
      %15 = vector.broadcast %cst_13 : f32 to vector<8x128xf32>
      %16 = arith.cmpf ogt, %14, %15 : vector<8x128xf32>
      %17 = vector.broadcast %12 : f32 to vector<8x128xf32>
      %18 = arith.mulf %17, %14 : vector<8x128xf32>
      %19 = arith.select %16, %14, %18 : vector<8x128xi1>, vector<8x128xf32>
      %c0_14 = arith.constant 0 : index
      %c0_15 = arith.constant 0 : index
      %20 = vector.load %arg5[%c0_14, %c0_15] : memref<128x128xf32, #tpu.memory_space<vmem>>, vector<128x128xf32>
      %cst_16 = arith.constant dense<0.000000e+00> : vector<8x128xf32>
      %21 = tpu.matmul %19, %20, %cst_16 {dimension_numbers = #tpu.dot_dimension_numbers<[1], [0], [0], [1], [0, 0, 1, 1], [], []>} : vector<8x128xf32>, vector<128x128xf32>, vector<8x128xf32> -> vector<8x128xf32>
      %c0_17 = arith.constant 0 : index
      %c0_18 = arith.constant 0 : index
      %22 = vector.load %arg9[%c0_17, %c0_18] : memref<8x128xf32, #tpu.memory_space<vmem>>, vector<8x128xf32>
      %23 = arith.addf %22, %21 : vector<8x128xf32>
      %c0_19 = arith.constant 0 : index
      %c0_20 = arith.constant 0 : index
      %24 = vector.load %arg6[%c0_19, %c0_20] : memref<8x1xf32, #tpu.memory_space<vmem>>, vector<8x1xf32>
      %25 = vector.broadcast %24 : vector<8x1xf32> to vector<8x128xf32>
      %26 = arith.mulf %23, %25 : vector<8x128xf32>
      %cst_21 = arith.constant 0.000000e+00 : f32
      %27 = vector.broadcast %cst_21 : f32 to vector<8x128xf32>
      %28 = arith.cmpf ogt, %26, %27 : vector<8x128xf32>
      %29 = vector.broadcast %12 : f32 to vector<8x128xf32>
      %30 = arith.mulf %29, %26 : vector<8x128xf32>
      %31 = arith.select %28, %26, %30 : vector<8x128xi1>, vector<8x128xf32>
      %c0_22 = arith.constant 0 : index
      %c0_23 = arith.constant 0 : index
      %32 = vector.load %arg8[%c0_22, %c0_23] : memref<8x128xf32, #tpu.memory_space<vmem>>, vector<8x128xf32>
      tpu.vector_store %arg8[%c0_22, %c0_23], %31 {strides = array<i32>} : memref<8x128xf32, #tpu.memory_space<vmem>>, vector<8x128xf32>,
    } else {
    }
    return
  }
  func.func @transform_0(%arg0: i32, %arg1: i32) -> (i32, i32) {
    %c0_i32 = arith.constant 0 : i32
    return %arg0, %arg1 : i32, i32
  }
  func.func @transform_1(%arg0: i32, %arg1: i32) -> (i32, i32) {
    %c0_i32 = arith.constant 0 : i32
    %c0_i32_0 = arith.constant 0 : i32
    return %arg1, %c0_i32 : i32, i32
  }
  func.func @transform_2(%arg0: i32, %arg1: i32) -> (i32, i32) {
    %c0_i32 = arith.constant 0 : i32
    %c0_i32_0 = arith.constant 0 : i32
    return %arg0, %c0_i32 : i32, i32
  }
  func.func @transform_3(%arg0: i32, %arg1: i32) -> (i32, i32) {
    %c0_i32 = arith.constant 0 : i32
    %c0_i32_0 = arith.constant 0 : i32
    %c0_i32_1 = arith.constant 0 : i32
    return %c0_i32, %c0_i32_0 : i32, i32
  }
  func.func @transform_4(%arg0: i32, %arg1: i32) -> (i32, i32) {
    %c0_i32 = arith.constant 0 : i32
    %c0_i32_0 = arith.constant 0 : i32
    return %arg0, %c0_i32 : i32, i32
  }
  func.func @transform_5(%arg0: i32, %arg1: i32) -> i32 {
    %c0_i32 = arith.constant 0 : i32
    %c0_i32_0 = arith.constant 0 : i32
    return %c0_i32 : i32
  }
  func.func @transform_6(%arg0: i32, %arg1: i32) -> (i32, i32) {
    %c0_i32 = arith.constant 0 : i32
    %c0_i32_0 = arith.constant 0 : i32
    return %arg0, %c0_i32 : i32, i32
  }
}

</mosaic_0001>

<bundles_post_ra>
// kernel: hypercl_forward.6
= control target key start
LH: loop header
LB: loop body
LE: loop exit
PB: predicated region body
PF: predicated region fallthrough
CT: control target
= control target key end

     0   :  { %v158_v0 = vmov 0.0   ;;  %vm159_vm0 = vmmov 0   ;;  %s229_s1 = inlined_call_operand.vmem [shape: f32[128,128], index: 1, kind: input, shape index: {}]   ;;  %s230_s0 = inlined_call_operand.vmem [shape: f32[8,128], index: 0, kind: input, shape index: {}]   ;;  %s231_s2 = inlined_call_operand.vmem [shape: bf16[8,128], index: 2, kind: output, shape index: {}]  }
   0x1   :  { %121 = vmatprep.subr.mxu0 %v158_v0  ;;  %v27_v1 = vld [vmem:[%s229_s1 + $0x78] sm:$0xff]  ;;  %v26_v2 = vld [vmem:[%s229_s1 + $0x70] sm:$0xff]  ;;  %153 = vmatprep.mubr.msk.f32.mxu0 %vm159_vm0, %v158_v0  ;;  %v25_v3 = vld [vmem:[%s229_s1 + $0x68] sm:$0xff] }
   0x2   :  { %122 = vmatpush3.msra.mxu0 %v27_v1  ;;  %v24_v4 = vld [vmem:[%s229_s1 + $0x60] sm:$0xff]  ;;  %v23_v5 = vld [vmem:[%s229_s1 + $0x58] sm:$0xff]  ;;  %v22_v6 = vld [vmem:[%s229_s1 + $0x50] sm:$0xff] }
   0x3   :  { %123 = vmatprep.subr.mxu0 %v158_v0  ;;  %v21_v7 = vld [vmem:[%s229_s1 + $0x48] sm:$0xff]  ;;  %v20_v8 = vld [vmem:[%s229_s1 + $0x40] sm:$0xff]  ;;  %v19_v9 = vld [vmem:[%s229_s1 + $0x38] sm:$0xff] }
   0x4   :  { %124 = vmatpush3.msra.mxu0 %v26_v2  ;;  %v18_v10 = vld [vmem:[%s229_s1 + $0x30] sm:$0xff]  ;;  %v17_v11 = vld [vmem:[%s229_s1 + $0x28] sm:$0xff]  ;;  %v16_v12 = vld [vmem:[%s229_s1 + $0x20] sm:$0xff] }
   0x5   :  { %125 = vmatprep.subr.mxu0 %v158_v0  ;;  %v15_v13 = vld [vmem:[%s229_s1 + $0x18] sm:$0xff]  ;;  %v14_v14 = vld [vmem:[%s229_s1 + $0x10] sm:$0xff]  ;;  %v13_v15 = vld [vmem:[%s229_s1 + $0x8] sm:$0xff] }
   0x6   :  { %126 = vmatpush3.msra.mxu0 %v25_v3  ;;  %v12_v16 = vld [vmem:[%s229_s1] sm:$0xff] }
   0x7   :  { %127 = vmatprep.subr.mxu0 %v158_v0  ;;  %v11_v17 = vld [vmem:[%s230_s0] sm:$0xff] }
   0x8   :  { %128 = vmatpush3.msra.mxu0 %v24_v4 }
   0x9   :  { %129 = vmatprep.subr.mxu0 %v158_v0 }
   0xa   :  { %130 = vmatpush3.msra.mxu0 %v23_v5 }
   0xb   :  { %131 = vmatprep.subr.mxu0 %v158_v0 }
   0xc   :  { %132 = vmatpush3.msra.mxu0 %v22_v6 }
   0xd   :  { %133 = vmatprep.subr.mxu0 %v158_v0 }
   0xe   :  { %134 = vmatpush3.msra.mxu0 %v21_v7 }
   0xf   :  { %135 = vmatprep.subr.mxu0 %v158_v0 }
  0x10   :  { %136 = vmatpush3.msra.mxu0 %v20_v8 }
  0x11   :  { %137 = vmatprep.subr.mxu0 %v158_v0 }
  0x12   :  { %138 = vmatpush3.msra.mxu0 %v19_v9 }
  0x13   :  { %139 = vmatprep.subr.mxu0 %v158_v0 }
  0x14   :  { %140 = vmatpush3.msra.mxu0 %v18_v10 }
  0x15   :  { %141 = vmatprep.subr.mxu0 %v158_v0 }
  0x16   :  { %142 = vmatpush3.msra.mxu0 %v17_v11 }
  0x17   :  { %143 = vmatprep.subr.mxu0 %v158_v0 }
  0x18   :  { %144 = vmatpush3.msra.mxu0 %v16_v12 }
  0x19   :  { %145 = vmatprep.subr.mxu0 %v158_v0 }
  0x1a   :  { %146 = vmatpush3.msra.mxu0 %v15_v13 }
  0x1b   :  { %147 = vmatprep.subr.mxu0 %v158_v0 }
  0x1c   :  { %148 = vmatpush3.msra.mxu0 %v14_v14 }
  0x1d   :  { %149 = vmatprep.subr.mxu0 %v158_v0 }
  0x1e   :  { %150 = vmatpush3.msra.mxu0 %v13_v15 }
  0x1f   :  { %151 = vmatprep.subr.mxu0 %v158_v0 }
  0x20   :  { %152 = vmatpush3.msra.mxu0 %v12_v16 }
  0x21   :  { %154 = vmatmul.mubr.f32.vlgmr.msra.gmra.mxu0 %v11_v17 }
  0xe1   :  { %v94_v18 = vpop.f32.mrf.mxu0 }
  0xe2   :  { %v98_v19 = vpack.c.bf16 %v94_v18, %v94_v18 }
  0xe3   :  { %v155_v20 = vpop.f32.mrf.mxu0 }
  0xe4   :  { %99 = vst [vmem:[%s231_s2] sm:$0xf] %v98_v19 }

// kernel: hypercl_forward.8
= control target key start
LH: loop header
LB: loop body
LE: loop exit
PB: predicated region body
PF: predicated region fallthrough
CT: control target
= control target key end

     0   :  { %v352_v0 = vmov 0.0   ;;  %vm353_vm0 = vmmov 0   ;;  %v354_v7 = vmov 0   ;;  %s503_s3 = inlined_call_operand.vmem [shape: f32[128,128], index: 3, kind: input, shape index: {}]   ;;  %s504_s1 = inlined_call_operand.vmem [shape: bf16[128,128], index: 1, kind: input, shape index: {}]   ;;  %s505_s4 = inlined_call_operand.vmem [shape: f32[8,1], index: 4, kind: input, shape index: {}]   ;;  %s506_s2 = inlined_call_operand.vmem [shape: bf16[8,128], index: 2, kind: input, shape index: {}]   ;;  %s507_s5 = inlined_call_operand.<no memory space> [shape: f32[1], index: 5, kind: input, shape index: {}]   ;;  %s508_s0 = inlined_call_operand.vmem [shape: bf16[8,128], index: 0, kind: input, shape index: {}]   ;;  %s509_s6 = inlined_call_operand.vmem [shape: f32[8,128], index: 6, kind: output, shape index: {}]  }
   0x1   :  { %305 = vmatprep.subr.mxu1 %v352_v0  ;;  %v163_v1 = vld [vmem:[%s503_s3 + $0x78] sm:$0xff]  ;;  %285 = vmatprep.subr.bf16.mxu0 %v352_v0  ;;  %v162_v3 = vld [vmem:[%s503_s3 + $0x70] sm:$0xff]  ;;  %v161_v4 = vld [vmem:[%s503_s3 + $0x68] sm:$0xff]  ;;  %v145_v24 = vstv %s507_s5 }
   0x2   :  { %306 = vmatpush3.msra.mxu1 %v163_v1  ;;  %v344_v2 = vld [vmem:[%s504_s1 + $0x38] sm:$0xff]   ;;  %337 = vmatprep.mubr.msk.f32.mxu1 %vm353_vm0, %v352_v0  ;;  %v345_v5 = vld [vmem:[%s504_s1 + $0x30] sm:$0xff]   ;;  %v160_v6 = vld [vmem:[%s503_s3 + $0x60] sm:$0xff] }
   0x3   :  { %307 = vmatprep.subr.mxu1 %v352_v0  ;;  %301 = vmatprep.mubr.msk.bf16.mxu0 %vm353_vm0, %v352_v0  ;;  %v159_v8 = vld [vmem:[%s503_s3 + $0x58] sm:$0xff]  ;;  %v346_v9 = vld [vmem:[%s504_s1 + $0x28] sm:$0xff]   ;;  %v158_v10 = vld [vmem:[%s503_s3 + $0x50] sm:$0xff] }
   0x4   :  { %286 = vmatpush3.bf16.msra.mxu0 %v344_v2  ;;  %308 = vmatpush3.msra.mxu1 %v162_v3  ;;  %v157_v11 = vld [vmem:[%s503_s3 + $0x48] sm:$0xff]  ;;  %v347_v12 = vld [vmem:[%s504_s1 + $0x20] sm:$0xff]   ;;  %v155_v14 = vld [vmem:[%s503_s3 + $0x38] sm:$0xff] }
   0x5   :  { %309 = vmatprep.subr.mxu1 %v352_v0  ;;  %287 = vmatprep.subr.bf16.mxu0 %v352_v0  ;;  %v156_v13 = vld [vmem:[%s503_s3 + $0x40] sm:$0xff]  ;;  %v348_v16 = vld [vmem:[%s504_s1 + $0x18] sm:$0xff]   ;;  %v154_v17 = vld [vmem:[%s503_s3 + $0x30] sm:$0xff] }
   0x6   :  { %310 = vmatpush3.msra.mxu1 %v161_v4  ;;  %343 = vset.pattern.permute.xlu0 %v354_v7  ;;  %v236_v15 = vld [vmem:[%s505_s4] sm:$0xff]  ;;  %v153_v18 = vld [vmem:[%s503_s3 + $0x28] sm:$0xff]  ;;  %v349_v20 = vld [vmem:[%s504_s1 + $0x10] sm:$0xff]  }
   0x7   :  { %311 = vmatprep.subr.mxu1 %v352_v0  ;;  %239 = vperm.xlu0 %343, %v236_v15   ;;  %v142_v19 = vld [vmem:[%s506_s2] sm:$0xf]  ;;  %v151_v23 = vld [vmem:[%s503_s3 + $0x18] sm:$0xff]  ;;  %v350_v25 = vld [vmem:[%s504_s1 + $0x8] sm:$0xff]  }
   0x8   :  { %288 = vmatpush3.bf16.msra.mxu0 %v345_v5  ;;  %312 = vmatpush3.msra.mxu1 %v160_v6  ;;  %v152_v21 = vld [vmem:[%s503_s3 + $0x20] sm:$0xff]  ;;  %v143_v22 = vunpack.c.l.bf16 %v142_v19  ;;  %v150_v26 = vld [vmem:[%s503_s3 + $0x10] sm:$0xff]  ;;  %v149_v28 = vld [vmem:[%s503_s3 + $0x8] sm:$0xff] }
   0x9   :  { %313 = vmatprep.subr.mxu1 %v352_v0  ;;  %289 = vmatprep.subr.bf16.mxu0 %v352_v0  ;;  %v351_v29 = vld [vmem:[%s504_s1] sm:$0xff]  }
   0xa   :  { %314 = vmatpush3.msra.mxu1 %v159_v8  ;;  %v146_v27 = vmul.f32 %v145_v24, %v143_v22  ;;  %vm144_vm1 = vcmp.gt.f32.partialorder %v143_v22, 0.0  ;;  %v148_v30 = vld [vmem:[%s503_s3] sm:$0xff] }
   0xb   :  { %315 = vmatprep.subr.mxu1 %v352_v0  ;;  %v31_v32 = vld [vmem:[%s508_s0] sm:$0xf] }
   0xc   :  { %290 = vmatpush3.bf16.msra.mxu0 %v346_v9  ;;  %316 = vmatpush3.msra.mxu1 %v158_v10  ;;  %v147_v31 = vsel %vm144_vm1, %v143_v22, %v146_v27 }
   0xd   :  { %317 = vmatprep.subr.mxu1 %v352_v0  ;;  %291 = vmatprep.subr.bf16.mxu0 %v352_v0 }
   0xe   :  { %318 = vmatpush3.msra.mxu1 %v157_v11 }
   0xf   :  { %319 = vmatprep.subr.mxu1 %v352_v0 }
  0x10   :  { %292 = vmatpush3.bf16.msra.mxu0 %v347_v12  ;;  %320 = vmatpush3.msra.mxu1 %v156_v13 }
  0x11   :  { %321 = vmatprep.subr.mxu1 %v352_v0  ;;  %293 = vmatprep.subr.bf16.mxu0 %v352_v0 }
  0x12   :  { %322 = vmatpush3.msra.mxu1 %v155_v14 }
  0x13   :  { %323 = vmatprep.subr.mxu1 %v352_v0 }
  0x14   :  { %294 = vmatpush3.bf16.msra.mxu0 %v348_v16  ;;  %324 = vmatpush3.msra.mxu1 %v154_v17 }
  0x15   :  { %325 = vmatprep.subr.mxu1 %v352_v0  ;;  %295 = vmatprep.subr.bf16.mxu0 %v352_v0 }
  0x16   :  { %326 = vmatpush3.msra.mxu1 %v153_v18 }
  0x17   :  { %327 = vmatprep.subr.mxu1 %v352_v0 }
  0x18   :  { %296 = vmatpush3.bf16.msra.mxu0 %v349_v20  ;;  %328 = vmatpush3.msra.mxu1 %v152_v21 }
  0x19   :  { %329 = vmatprep.subr.mxu1 %v352_v0  ;;  %297 = vmatprep.subr.bf16.mxu0 %v352_v0 }
  0x1a   :  { %330 = vmatpush3.msra.mxu1 %v151_v23 }
  0x1b   :  { %331 = vmatprep.subr.mxu1 %v352_v0 }
  0x1c   :  { %298 = vmatpush3.bf16.msra.mxu0 %v350_v25  ;;  %332 = vmatpush3.msra.mxu1 %v150_v26 }
  0x1d   :  { %333 = vmatprep.subr.mxu1 %v352_v0  ;;  %299 = vmatprep.subr.bf16.mxu0 %v352_v0 }
  0x1e   :  { %334 = vmatpush3.msra.mxu1 %v149_v28 }
  0x1f   :  { %335 = vmatprep.subr.mxu1 %v352_v0 }
  0x20   :  { %300 = vmatpush3.bf16.msra.mxu0 %v351_v29  ;;  %336 = vmatpush3.msra.mxu1 %v148_v30 }
  0x21   :  { %338 = vmatmul.mubr.f32.vlgmr.msra.gmra.mxu1 %v147_v31 }
  0x23   :  { %302 = vmatmul.mubr.bf16.vlgmr.msra.gmra.mxu0 %v31_v32 }
  0x82   :  { %v240_v34 = vpop.permute.xlu0 %239 }
  0xe1   :  { %v230_v33 = vpop.f32.mrf.mxu1 }
  0xe3   :  { %v130_v35 = vpop.f32.mrf.mxu0  ;;  %v339_v36 = vpop.f32.mrf.mxu1 }
  0xe4   :  { %v235_v37 = vadd.f32 %v230_v33, %v130_v35 }
  0xe5   :  { %v303_v38 = vpop.f32.mrf.mxu0 }
  0xe6   :  { %v242_v39 = vmul.f32 %v240_v34, %v235_v37 }
  0xe7   :  { %v133_v40 = vpop.f32.mrf.mxu0 }
  0xe8   :  { %vm243_vm2 = vcmp.gt.f32.partialorder %v242_v39, 0.0  ;;  %v244_v41 = vmul.f32 %v242_v39, %v145_v24 }
  0xe9   :  { %v304_v42 = vpop.f32.mrf.mxu0 }
  0xea   :  { %v245_v43 = vsel %vm243_vm2, %v242_v39, %v244_v41 }
  0xeb   :  { %246 = vst [vmem:[%s509_s6] sm:$0xff] %v245_v43 }

// kernel: hypercl_forward.7
= control target key start
LH: loop header
LB: loop body
LE: loop exit
PB: predicated region body
PF: predicated region fallthrough
CT: control target
= control target key end

     0   :  { %vm101_vm0 = vcmask 1043456   ;;  %v898_v2 = vmov 0   ;;  %vm76_vm1 = vcmask 64512   ;;  %s1100_s0 = inlined_call_operand.vmem [shape: bf16[8,128], index: 0, kind: input, shape index: {}]   ;;  %s1101_s1 = inlined_call_operand.vmem [shape: bf16[8,128], index: 1, kind: input, shape index: {}]   ;;  %s1102_s3 = inlined_call_operand.vmem [shape: f32[128,1], index: 3, kind: input, shape index: {}]   ;;  %s1103_s2 = inlined_call_operand.vmem [shape: f32[128,128], index: 2, kind: input, shape index: {}]   ;;  %s1104_s4 = inlined_call_operand.<no memory space> [shape: f32[1], index: 4, kind: input, shape index: {}]   ;;  %s1105_s5 = inlined_call_operand.vmem [shape: bf16[128,128], index: 5, kind: output, shape index: {}]  }
   0x1   :  { %v58_v0 = vld [vmem:[%s1100_s0] sm:$0xf]  ;;  %897 = vset.pattern.permute.xlu1 %v898_v2  ;;  %v261_v3 = vld [vmem:[%s1102_s3 + $0x38] sm:$0xff]  ;;  %v263_v6 = vld [vmem:[%s1102_s3 + $0x48] sm:$0xff]  ;;  %v1052_v58 = vstv %s1104_s4 }
   0x2   :  { %v59_v1 = vld [vmem:[%s1101_s1] sm:$0xf]  ;;  %60 = vxpose.xlu0.c.b16.start.end [1/1] (short) %v58_v0, 128  ;;  %307 = vperm.xlu1 %897, %v261_v3   ;;  %v264_v8 = vld [vmem:[%s1102_s3 + $0x50] sm:$0xff]  ;;  %v255_v9 = vld [vmem:[%s1102_s3 + $0x8] sm:$0xff] }
   0x3   :  { %894 = vmatprep.subr.msk.bf16.mxu0 %vm101_vm0, %v59_v1  ;;  %v103_v4 = vsel %vm101_vm0, %v59_v1, 0  ;;  %v262_v5 = vld [vmem:[%s1102_s3 + $0x40] sm:$0xff]  ;;  %v265_v10 = vld [vmem:[%s1102_s3 + $0x58] sm:$0xff]  ;;  %v256_v11 = vld [vmem:[%s1102_s3 + $0x10] sm:$0xff] }
   0x4   :  { %789 = vmatpush3.bf16.msra.mxu0 %v103_v4  ;;  %v254_v7 = vld [vmem:[%s1102_s3] sm:$0xff]  ;;  %v257_v13 = vld [vmem:[%s1102_s3 + $0x18] sm:$0xff]  ;;  %v260_v14 = vld [vmem:[%s1102_s3 + $0x30] sm:$0xff] }
   0x5   :  { %v266_v12 = vld [vmem:[%s1102_s3 + $0x60] sm:$0xff]  ;;  %v430_v15 = vld [vmem:[%s1103_s2 + $0x78] sm:$0xff]  ;;  %v267_v16 = vld [vmem:[%s1102_s3 + $0x68] sm:$0xff] }
   0x6   :  { %312 = vperm.xlu1 %897, %v262_v5   ;;  %v258_v17 = vld [vmem:[%s1102_s3 + $0x20] sm:$0xff]  ;;  %806 = vmatprep.subr.mxu0 %v430_v15  ;;  %v429_v18 = vld [vmem:[%s1103_s2 + $0x70] sm:$0xff]  ;;  %v259_v20 = vld [vmem:[%s1102_s3 + $0x28] sm:$0xff] }
   0x7   :  { %862 = vmatprep.subr.mxu1 %v430_v15  ;;  %v268_v19 = vld [vmem:[%s1102_s3 + $0x70] sm:$0xff]  ;;  %v428_v21 = vld [vmem:[%s1103_s2 + $0x68] sm:$0xff]  ;;  %v269_v22 = vld [vmem:[%s1102_s3 + $0x78] sm:$0xff] }
   0x8   :  { %878 = vmatpush3.msra.mxu1 %v430_v15  ;;  %v427_v23 = vld [vmem:[%s1103_s2 + $0x60] sm:$0xff]  ;;  %v426_v24 = vld [vmem:[%s1103_s2 + $0x58] sm:$0xff]  ;;  %v425_v25 = vld [vmem:[%s1103_s2 + $0x50] sm:$0xff] }
   0x9   :  { %863 = vmatprep.subr.mxu1 %v429_v18  ;;  %v424_v26 = vld [vmem:[%s1103_s2 + $0x48] sm:$0xff]  ;;  %v423_v27 = vld [vmem:[%s1103_s2 + $0x40] sm:$0xff]  ;;  %v422_v28 = vld [vmem:[%s1103_s2 + $0x38] sm:$0xff] }
   0xa   :  { %317 = vperm.xlu1 %897, %v263_v6   ;;  %879 = vmatpush3.msra.mxu1 %v429_v18  ;;  %v421_v29 = vld [vmem:[%s1103_s2 + $0x30] sm:$0xff]  ;;  %v420_v38 = vld [vmem:[%s1103_s2 + $0x28] sm:$0xff]  ;;  %v419_v39 = vld [vmem:[%s1103_s2 + $0x20] sm:$0xff] }
   0xb   :  { %896 = vset.pattern.permute.xlu0 %v898_v2  ;;  %864 = vmatprep.subr.mxu1 %v428_v21  ;;  %v418_v40 = vld [vmem:[%s1103_s2 + $0x18] sm:$0xff]  ;;  %v417_v41 = vld [vmem:[%s1103_s2 + $0x10] sm:$0xff]  ;;  %v416_v42 = vld [vmem:[%s1103_s2 + $0x8] sm:$0xff] }
   0xc   :  { %880 = vmatpush3.msra.mxu1 %v428_v21  ;;  %v415_v43 = vld [vmem:[%s1103_s2] sm:$0xff] }
   0xd   :  { %865 = vmatprep.subr.mxu1 %v427_v23 }
   0xe   :  { %272 = vperm.xlu1 %897, %v254_v7   ;;  %881 = vmatpush3.msra.mxu1 %v427_v23 }
   0xf   :  { %866 = vmatprep.subr.mxu1 %v426_v24 }
  0x10   :  { %882 = vmatpush3.msra.mxu1 %v426_v24 }
  0x11   :  { %867 = vmatprep.subr.mxu1 %v425_v25 }
  0x12   :  { %322 = vperm.xlu1 %897, %v264_v8   ;;  %883 = vmatpush3.msra.mxu1 %v425_v25 }
  0x13   :  { %868 = vmatprep.subr.mxu1 %v424_v26 }
  0x14   :  { %884 = vmatpush3.msra.mxu1 %v424_v26 }
  0x15   :  { %869 = vmatprep.subr.mxu1 %v423_v27 }
  0x16   :  { %277 = vperm.xlu1 %897, %v255_v9   ;;  %885 = vmatpush3.msra.mxu1 %v423_v27 }
  0x17   :  { %870 = vmatprep.subr.mxu1 %v422_v28 }
  0x18   :  { %886 = vmatpush3.msra.mxu1 %v422_v28 }
  0x19   :  { %871 = vmatprep.subr.mxu1 %v421_v29 }
  0x1a   :  { %327 = vperm.xlu1 %897, %v265_v10   ;;  %887 = vmatpush3.msra.mxu1 %v421_v29 }
  0x1b   :  { %872 = vmatprep.subr.mxu1 %v420_v38 }
  0x1c   :  { %888 = vmatpush3.msra.mxu1 %v420_v38 }
  0x1d   :  { %873 = vmatprep.subr.mxu1 %v419_v39 }
  0x1e   :  { %282 = vperm.xlu1 %897, %v256_v11   ;;  %889 = vmatpush3.msra.mxu1 %v419_v39 }
  0x1f   :  { %874 = vmatprep.subr.mxu1 %v418_v40 }
  0x20   :  { %890 = vmatpush3.msra.mxu1 %v418_v40 }
  0x21   :  { %875 = vmatprep.subr.mxu1 %v417_v41 }
  0x22   :  { %332 = vperm.xlu1 %897, %v266_v12   ;;  %891 = vmatpush3.msra.mxu1 %v417_v41 }
  0x23   :  { %876 = vmatprep.subr.mxu1 %v416_v42 }
  0x24   :  { %892 = vmatpush3.msra.mxu1 %v416_v42 }
  0x25   :  { %877 = vmatprep.subr.mxu1 %v415_v43 }
  0x26   :  { %287 = vperm.xlu1 %897, %v257_v13   ;;  %893 = vmatpush3.msra.mxu1 %v415_v43 }
  0x27   :  { %302 = vperm.xlu0 %896, %v260_v14  }
  0x2a   :  { %337 = vperm.xlu1 %897, %v267_v16  }
  0x2b   :  { %292 = vperm.xlu0 %896, %v258_v17  }
  0x2e   :  { %342 = vperm.xlu1 %897, %v268_v19  }
  0x2f   :  { %297 = vperm.xlu0 %896, %v259_v20  }
  0x32   :  { %347 = vperm.xlu1 %897, %v269_v22  }
  0x64   :  { %v68_v30 = vpop.trf.xlu0 }
  0x65   :  { %790 = vmatprep.mubr.msk.bf16.mxu0 %vm76_vm1, %v68_v30 }
  0x68   :  { %v69_v31 = vpop.trf.xlu0 }
  0x69   :  { %791 = vmatmul.mubr.msk.bf16.vlgmr.msra.gmra.mxu0 %vm76_vm1, %v69_v31 }
  0x6a   :  { %807 = vmatpush3.msra.mxu0 %v430_v15 }
  0x6b   :  { %808 = vmatprep.subr.mxu0 %v429_v18 }
  0x6c   :  { %v70_v32 = vpop.trf.xlu0  ;;  %809 = vmatpush3.msra.mxu0 %v429_v18 }
  0x6d   :  { %794 = vmatprep.mubr.msk.bf16.mxu0 %vm76_vm1, %v70_v32  ;;  %810 = vmatprep.subr.mxu0 %v428_v21 }
  0x6e   :  { %811 = vmatpush3.msra.mxu0 %v428_v21 }
  0x6f   :  { %812 = vmatprep.subr.mxu0 %v427_v23 }
  0x70   :  { %v71_v33 = vpop.trf.xlu0  ;;  %813 = vmatpush3.msra.mxu0 %v427_v23 }
  0x71   :  { %795 = vmatmul.mubr.msk.bf16.gmra.mxu0 %vm76_vm1, %v71_v33  ;;  %814 = vmatprep.subr.mxu0 %v426_v24 }
  0x72   :  { %815 = vmatpush3.msra.mxu0 %v426_v24 }
  0x73   :  { %816 = vmatprep.subr.mxu0 %v425_v25 }
  0x74   :  { %v72_v34 = vpop.trf.xlu0  ;;  %817 = vmatpush3.msra.mxu0 %v425_v25 }
  0x75   :  { %798 = vmatprep.mubr.msk.bf16.mxu0 %vm76_vm1, %v72_v34  ;;  %818 = vmatprep.subr.mxu0 %v424_v26 }
  0x76   :  { %819 = vmatpush3.msra.mxu0 %v424_v26 }
  0x77   :  { %820 = vmatprep.subr.mxu0 %v423_v27 }
  0x78   :  { %v73_v35 = vpop.trf.xlu0  ;;  %821 = vmatpush3.msra.mxu0 %v423_v27 }
  0x79   :  { %799 = vmatmul.mubr.msk.bf16.gmra.mxu0 %vm76_vm1, %v73_v35  ;;  %822 = vmatprep.subr.mxu0 %v422_v28 }
  0x7a   :  { %823 = vmatpush3.msra.mxu0 %v422_v28 }
  0x7b   :  { %824 = vmatprep.subr.mxu0 %v421_v29 }
  0x7c   :  { %v74_v36 = vpop.trf.xlu0  ;;  %825 = vmatpush3.msra.mxu0 %v421_v29 }
  0x7d   :  { %802 = vmatprep.mubr.msk.bf16.mxu0 %vm76_vm1, %v74_v36  ;;  %826 = vmatprep.subr.mxu0 %v420_v38  ;;  %v308_v44 = vpop.permute.xlu1 %307 }
  0x7e   :  { %827 = vmatpush3.msra.mxu0 %v420_v38 }
  0x7f   :  { %828 = vmatprep.subr.mxu0 %v419_v39 }
  0x80   :  { %v75_v37 = vpop.trf.xlu0  ;;  %829 = vmatpush3.msra.mxu0 %v419_v39 }
  0x81   :  { %803 = vmatmul.mubr.msk.bf16.gmra.mxu0 %vm76_vm1, %v75_v37  ;;  %830 = vmatprep.subr.mxu0 %v418_v40  ;;  %v1039_v45 = vpop.permute.xlu1 %312 }
  0x82   :  { %831 = vmatpush3.msra.mxu0 %v418_v40 }
  0x83   :  { %832 = vmatprep.subr.mxu0 %v417_v41 }
  0x84   :  { %833 = vmatpush3.msra.mxu0 %v417_v41 }
  0x85   :  { %834 = vmatprep.subr.mxu0 %v416_v42  ;;  %v1041_v46 = vpop.permute.xlu1 %317 }
  0x86   :  { %835 = vmatpush3.msra.mxu0 %v416_v42 }
  0x87   :  { %836 = vmatprep.subr.mxu0 %v415_v43 }
  0x88   :  { %837 = vmatpush3.msra.mxu0 %v415_v43 }
  0x89   :  { %v273_v47 = vpop.permute.xlu1 %272 }
  0x8d   :  { %v1043_v48 = vpop.permute.xlu1 %322 }
  0x91   :  { %v278_v49 = vpop.permute.xlu1 %277 }
  0x95   :  { %v1045_v50 = vpop.permute.xlu1 %327 }
  0x99   :  { %v283_v51 = vpop.permute.xlu1 %282 }
  0x9d   :  { %v1047_v52 = vpop.permute.xlu1 %332 }
  0xa1   :  { %v288_v60 = vpop.permute.xlu1 %287 }
  0xa2   :  { %v303_v54 = vpop.permute.xlu0 %302 }
  0xa5   :  { %v338_v26 = vpop.permute.xlu1 %337 }
  0xa6   :  { %v293_v0 = vpop.permute.xlu0 %292 }
  0xa9   :  { %v343_v37 = vpop.permute.xlu1 %342 }
  0xaa   :  { %v298_v14 = vpop.permute.xlu0 %297 }
 0x129   :  { %v792_v53 = vpop.f32.mrf.mxu0 }
 0x12a   :  { %v352_v57 = vmul.f32 %v792_v53, %v283_v51 }
 0x12b   :  { %v139_v55 = vpop.f32.mrf.mxu0 }
 0x12c   :  { %v350_v56 = vmul.f32 %v273_v47, %v139_v55  ;;  %v385_v3 = vmul.f32 %v1052_v58, %v352_v57  ;;  %vm368_vm4 = vcmp.gt.f32.partialorder %v352_v57, 0.0 }
 0x12d   :  { %v793_v59 = vpop.f32.mrf.mxu0 }
 0x12e   :  { %v383_v61 = vmul.f32 %v1052_v58, %v350_v56  ;;  %vm366_vm2 = vcmp.gt.f32.partialorder %v350_v56, 0.0  ;;  %v353_v62 = vmul.f32 %v793_v59, %v288_v60  ;;  %v401_v13 = vsel %vm368_vm4, %v352_v57, %v385_v3 }
 0x12f   :  { %v142_v63 = vpop.f32.mrf.mxu0 }
 0x130   :  { %v351_v1 = vmul.f32 %v278_v49, %v142_v63  ;;  %v399_v2 = vsel %vm366_vm2, %v350_v56, %v383_v61  ;;  %v386_v7 = vmul.f32 %v1052_v58, %v353_v62  ;;  %vm369_vm5 = vcmp.gt.f32.partialorder %v353_v62, 0.0  ;;  %v348_v49 = vpop.permute.xlu1 %347 }
 0x131   :  { %v796_v4 = vpop.f32.mrf.mxu0  ;;  %838 = vmatprep.mubr.f32.mxu0 %v399_v2 }
 0x132   :  { %vm367_vm3 = vcmp.gt.f32.partialorder %v351_v1, 0.0  ;;  %v384_v5 = vmul.f32 %v1052_v58, %v351_v1  ;;  %v356_v6 = vmul.f32 %v796_v4, %v303_v54  ;;  %v402_v19 = vsel %vm369_vm5, %v353_v62, %v386_v7 }
 0x133   :  { %v155_v8 = vpop.f32.mrf.mxu0 }
 0x134   :  { %v400_v9 = vsel %vm367_vm3, %v351_v1, %v384_v5  ;;  %v354_v10 = vmul.f32 %v293_v0, %v155_v8  ;;  %vm372_vm6 = vcmp.gt.f32.partialorder %v356_v6, 0.0  ;;  %v389_v11 = vmul.f32 %v1052_v58, %v356_v6 }
 0x135   :  { %v797_v12 = vpop.f32.mrf.mxu0  ;;  %839 = vmatmul.mubr.f32.vlgmr.msra.gmra.mxu0 %v400_v9 }
 0x136   :  { %v387_v15 = vmul.f32 %v1052_v58, %v354_v10  ;;  %v357_v16 = vmul.f32 %v797_v12, %v308_v44  ;;  %841 = vmatprep.mubr.f32.mxu0 %v401_v13  ;;  %v405_v17 = vsel %vm372_vm6, %v356_v6, %v389_v11  ;;  %vm370_vm7 = vcmp.gt.f32.partialorder %v354_v10, 0.0 }
 0x137   :  { %v158_v18 = vpop.f32.mrf.mxu0  ;;  %847 = vmatprep.mubr.f32.mxu1 %v405_v17 }
 0x138   :  { %v390_v20 = vmul.f32 %v1052_v58, %v357_v16  ;;  %v355_v21 = vmul.f32 %v298_v14, %v158_v18  ;;  %v403_v22 = vsel %vm370_vm7, %v354_v10, %v387_v15  ;;  %vm373_vm8 = vcmp.gt.f32.partialorder %v357_v16, 0.0 }
 0x139   :  { %v800_v23 = vpop.f32.mrf.mxu0  ;;  %842 = vmatmul.mubr.f32.gmra.mxu0 %v402_v19 }
 0x13a   :  { %v388_v24 = vmul.f32 %v1052_v58, %v355_v21  ;;  %844 = vmatprep.mubr.f32.mxu0 %v403_v22  ;;  %v406_v25 = vsel %vm373_vm8, %v357_v16, %v390_v20  ;;  %vm371_vm9 = vcmp.gt.f32.partialorder %v355_v21, 0.0  ;;  %v360_v30 = vmul.f32 %v800_v23, %v1043_v48 }
 0x13b   :  { %v171_v27 = vpop.f32.mrf.mxu0  ;;  %848 = vmatmul.mubr.f32.vlgmr.msra.gmra.mxu1 %v406_v25 }
 0x13c   :  { %v358_v28 = vmul.f32 %v1039_v45, %v171_v27  ;;  %v404_v29 = vsel %vm371_vm9, %v355_v21, %v388_v24  ;;  %v393_v38 = vmul.f32 %v1052_v58, %v360_v30  ;;  %vm376_vm12 = vcmp.gt.f32.partialorder %v360_v30, 0.0 }
 0x13d   :  { %v801_v31 = vpop.f32.mrf.mxu0  ;;  %845 = vmatmul.mubr.f32.gmra.mxu0 %v404_v29 }
 0x13e   :  { %v391_v32 = vmul.f32 %v1052_v58, %v358_v28  ;;  %vm374_vm10 = vcmp.gt.f32.partialorder %v358_v28, 0.0  ;;  %v361_v34 = vmul.f32 %v801_v31, %v1045_v50 }
 0x13f   :  { %v174_v33 = vpop.f32.mrf.mxu0 }
 0x140   :  { %v359_v35 = vmul.f32 %v1041_v46, %v174_v33  ;;  %v407_v36 = vsel %vm374_vm10, %v358_v28, %v391_v32  ;;  %v394_v42 = vmul.f32 %v1052_v58, %v361_v34  ;;  %v409_v46 = vsel %vm376_vm12, %v360_v30, %v393_v38 }
 0x141   :  { %v804_v39 = vpop.f32.mrf.mxu0  ;;  %850 = vmatprep.mubr.f32.mxu1 %v407_v36  ;;  %vm377_vm13 = vcmp.gt.f32.partialorder %v361_v34, 0.0 }
 0x142   :  { %v392_v40 = vmul.f32 %v1052_v58, %v359_v35  ;;  %vm375_vm11 = vcmp.gt.f32.partialorder %v359_v35, 0.0  ;;  %v364_v45 = vmul.f32 %v804_v39, %v343_v37  ;;  %v410_v54 = vsel %vm377_vm13, %v361_v34, %v394_v42 }
 0x143   :  { %v187_v41 = vpop.f32.mrf.mxu0 }
 0x144   :  { %v362_v43 = vmul.f32 %v1047_v52, %v187_v41  ;;  %v408_v44 = vsel %vm375_vm11, %v359_v35, %v392_v40  ;;  %v397_v56 = vmul.f32 %v1052_v58, %v364_v45  ;;  %vm380_vm0 = vcmp.gt.f32.partialorder %v364_v45, 0.0 }
 0x145   :  { %v805_v47 = vpop.f32.mrf.mxu0  ;;  %851 = vmatmul.mubr.f32.gmra.mxu1 %v408_v44 }
 0x146   :  { %v395_v48 = vmul.f32 %v1052_v58, %v362_v43  ;;  %853 = vmatprep.mubr.f32.mxu1 %v409_v46  ;;  %vm378_vm14 = vcmp.gt.f32.partialorder %v362_v43, 0.0  ;;  %v365_v51 = vmul.f32 %v805_v47, %v348_v49  ;;  %v413_v60 = vsel %vm380_vm0, %v364_v45, %v397_v56 }
 0x147   :  { %v190_v50 = vpop.f32.mrf.mxu0 }
 0x148   :  { %v363_v53 = vmul.f32 %v338_v26, %v190_v50  ;;  %v411_v55 = vsel %vm378_vm14, %v362_v43, %v395_v48  ;;  %v398_v57 = vmul.f32 %v1052_v58, %v365_v51  ;;  %vm381_vm1 = vcmp.gt.f32.partialorder %v365_v51, 0.0 }
 0x149   :  { %854 = vmatmul.mubr.f32.gmra.mxu1 %v410_v54 }
 0x14a   :  { %v396_v52 = vmul.f32 %v1052_v58, %v363_v53  ;;  %856 = vmatprep.mubr.f32.mxu1 %v411_v55  ;;  %vm379_vm15 = vcmp.gt.f32.partialorder %v363_v53, 0.0  ;;  %v414_v61 = vsel %vm381_vm1, %v365_v51, %v398_v57 }
 0x14c   :  { %v412_v59 = vsel %vm379_vm15, %v363_v53, %v396_v52 }
 0x14d   :  { %857 = vmatmul.mubr.f32.gmra.mxu1 %v412_v59 }
 0x14e   :  { %859 = vmatprep.mubr.f32.mxu1 %v413_v60 }
 0x151   :  { %860 = vmatmul.mubr.f32.gmra.mxu1 %v414_v61 }
 0x1f5   :  { %v840_v62 = vpop.f32.mrf.mxu0 }
 0x1f7   :  { %v497_v63 = vpop.f32.mrf.mxu0 }
 0x1f8   :  { %v703_v0 = vpack.c.bf16 %v840_v62, %v497_v63 }
 0x1f9   :  { %v843_v1 = vpop.f32.mrf.mxu0 }
 0x1fa   :  { %704 = vst [vmem:[%s1105_s5] sm:$0xff] %v703_v0  }
 0x1fb   :  { %v507_v2 = vpop.f32.mrf.mxu0  ;;  %v849_v3 = vpop.f32.mrf.mxu1 }
 0x1fc   :  { %v708_v4 = vpack.c.bf16 %v843_v1, %v507_v2 }
 0x1fd   :  { %v846_v5 = vpop.f32.mrf.mxu0  ;;  %v527_v58 = vpop.f32.mrf.mxu1 }
 0x1fe   :  { %740 = vst [vmem:[%s1105_s5 + $0x8] sm:$0xff] %v708_v4   ;;  %v718_v6 = vpack.c.bf16 %v849_v3, %v527_v58 }
 0x1ff   :  { %v517_v7 = vpop.f32.mrf.mxu0 }
 0x200   :  { %742 = vst [vmem:[%s1105_s5 + $0x18] sm:$0xff] %v718_v6   ;;  %v713_v8 = vpack.c.bf16 %v846_v5, %v517_v7 }
 0x202   :  { %741 = vst [vmem:[%s1105_s5 + $0x10] sm:$0xff] %v713_v8  }
 0x205   :  { %v852_v9 = vpop.f32.mrf.mxu1 }
 0x207   :  { %v537_v10 = vpop.f32.mrf.mxu1 }
 0x208   :  { %v723_v11 = vpack.c.bf16 %v852_v9, %v537_v10 }
 0x209   :  { %v855_v12 = vpop.f32.mrf.mxu1 }
 0x20a   :  { %743 = vst [vmem:[%s1105_s5 + $0x20] sm:$0xff] %v723_v11  }
 0x20b   :  { %v547_v13 = vpop.f32.mrf.mxu1 }
 0x20c   :  { %v728_v14 = vpack.c.bf16 %v855_v12, %v547_v13 }
 0x20d   :  { %v858_v15 = vpop.f32.mrf.mxu1 }
 0x20e   :  { %744 = vst [vmem:[%s1105_s5 + $0x28] sm:$0xff] %v728_v14  }
 0x20f   :  { %v557_v16 = vpop.f32.mrf.mxu1 }
 0x210   :  { %v733_v17 = vpack.c.bf16 %v858_v15, %v557_v16 }
 0x211   :  { %v861_v18 = vpop.f32.mrf.mxu1 }
 0x212   :  { %745 = vst [vmem:[%s1105_s5 + $0x30] sm:$0xff] %v733_v17  }
 0x213   :  { %v567_v19 = vpop.f32.mrf.mxu1 }
 0x214   :  { %v738_v20 = vpack.c.bf16 %v861_v18, %v567_v19 }
 0x216   :  { %746 = vst [vmem:[%s1105_s5 + $0x38] sm:$0xff] %v738_v20  }

// kernel: hypercl_forward.11
= control target key start
LH: loop header
LB: loop body
LE: loop exit
PB: predicated region body
PF: predicated region fallthrough
CT: control target
= control target key end

     0   :  { %v386_v1 = vmov 0.0   ;;  %vm387_vm0 = vmmov 0   ;;  %v388_v8 = vmov 0   ;;  %s538_s0 = inlined_call_operand.vmem [shape: bf16[8,128], index: 0, kind: input, shape index: {}]   ;;  %s539_s1 = inlined_call_operand.vmem [shape: bf16[128,128], index: 1, kind: input, shape index: {}]   ;;  %s540_s2 = inlined_call_operand.vmem [shape: bf16[8,128], index: 2, kind: input, shape index: {}]   ;;  %s541_s3 = inlined_call_operand.vmem [shape: f32[128,128], index: 3, kind: input, shape index: {}]   ;;  %s542_s4 = inlined_call_operand.vmem [shape: f32[8,1], index: 4, kind: input, shape index: {}]   ;;  %s543_s5 = inlined_call_operand.<no memory space> [shape: f32[1], index: 5, kind: input, shape index: {}]   ;;  %s544_s6 = inlined_call_operand.hbm [shape: f32[8,128], index: 6, kind: output, shape index: {}]  }
   0x1   :  { %v164_v0 = vld [vmem:[%s541_s3 + $0x78] sm:$0xff]  ;;  %316 = vmatprep.subr.mxu1 %v386_v1  ;;  %296 = vmatprep.subr.bf16.mxu0 %v386_v1  ;;  %v163_v3 = vld [vmem:[%s541_s3 + $0x70] sm:$0xff]  ;;  %v162_v4 = vld [vmem:[%s541_s3 + $0x68] sm:$0xff] }
   0x2   :  { %v356_v2 = vld [vmem:[%s539_s1 + $0x38] sm:$0xff]   ;;  %317 = vmatpush3.msra.mxu1 %v164_v0  ;;  %348 = vmatprep.mubr.msk.f32.mxu1 %vm387_vm0, %v386_v1  ;;  %v357_v5 = vld [vmem:[%s539_s1 + $0x30] sm:$0xff]   ;;  %v161_v6 = vld [vmem:[%s541_s3 + $0x60] sm:$0xff] }
   0x3   :  { %297 = vmatpush3.bf16.msra.mxu0 %v356_v2  ;;  %318 = vmatprep.subr.mxu1 %v386_v1  ;;  %v160_v7 = vld [vmem:[%s541_s3 + $0x58] sm:$0xff]  ;;  %v358_v9 = vld [vmem:[%s539_s1 + $0x28] sm:$0xff]   ;;  %v159_v10 = vld [vmem:[%s541_s3 + $0x50] sm:$0xff] }
   0x4   :  { %319 = vmatpush3.msra.mxu1 %v163_v3  ;;  %298 = vmatprep.subr.bf16.mxu0 %v386_v1  ;;  %v158_v11 = vld [vmem:[%s541_s3 + $0x48] sm:$0xff]  ;;  %v359_v12 = vld [vmem:[%s539_s1 + $0x20] sm:$0xff]  }
   0x5   :  { %320 = vmatprep.subr.mxu1 %v386_v1  ;;  %312 = vmatprep.mubr.msk.bf16.mxu0 %vm387_vm0, %v386_v1  ;;  %v157_v13 = vld [vmem:[%s541_s3 + $0x40] sm:$0xff] }
   0x6   :  { %321 = vmatpush3.msra.mxu1 %v162_v4  ;;  %355 = vset.pattern.permute.xlu0 %v388_v8  ;;  %v237_v14 = vld [vmem:[%s542_s4] sm:$0xff] }
   0x7   :  { %299 = vmatpush3.bf16.msra.mxu0 %v357_v5  ;;  %322 = vmatprep.subr.mxu1 %v386_v1 }
   0x8   :  { %323 = vmatpush3.msra.mxu1 %v161_v6  ;;  %300 = vmatprep.subr.bf16.mxu0 %v386_v1 }
   0x9   :  { %324 = vmatprep.subr.mxu1 %v386_v1 }
   0xa   :  { %325 = vmatpush3.msra.mxu1 %v160_v7 }
   0xb   :  { %301 = vmatpush3.bf16.msra.mxu0 %v358_v9  ;;  %326 = vmatprep.subr.mxu1 %v386_v1 }
   0xc   :  { %327 = vmatpush3.msra.mxu1 %v159_v10  ;;  %302 = vmatprep.subr.bf16.mxu0 %v386_v1 }
   0xd   :  { %328 = vmatprep.subr.mxu1 %v386_v1 }
   0xe   :  { %329 = vmatpush3.msra.mxu1 %v158_v11 }
   0xf   :  { %12 = vsyncpa [#allocation5], 0  ;;  %303 = vmatpush3.bf16.msra.mxu0 %v359_v12  ;;  %330 = vmatprep.subr.mxu1 %v386_v1  ;;  %v156_v15 = vld [vmem:[%s541_s3 + $0x38] sm:$0xff]  ;;  %v155_v17 = vld [vmem:[%s541_s3 + $0x30] sm:$0xff]  ;;  %v146_v25 = vstv %s543_s5 }
  0x10   :  { %v360_v16 = vld [vmem:[%s539_s1 + $0x18] sm:$0xff]   ;;  %331 = vmatpush3.msra.mxu1 %v157_v13  ;;  %304 = vmatprep.subr.bf16.mxu0 %v386_v1  ;;  %v154_v18 = vld [vmem:[%s541_s3 + $0x28] sm:$0xff]  ;;  %v361_v19 = vld [vmem:[%s539_s1 + $0x10] sm:$0xff]  }
  0x11   :  { %332 = vmatprep.subr.mxu1 %v386_v1  ;;  %240 = vperm.xlu0 %355, %v237_v14   ;;  %v143_v20 = vld [vmem:[%s540_s2] sm:$0xf]  ;;  %v152_v23 = vld [vmem:[%s541_s3 + $0x18] sm:$0xff]  ;;  %v362_v24 = vld [vmem:[%s539_s1 + $0x8] sm:$0xff]  }
  0x12   :  { %333 = vmatpush3.msra.mxu1 %v156_v15  ;;  %v153_v21 = vld [vmem:[%s541_s3 + $0x20] sm:$0xff]  ;;  %v144_v22 = vunpack.c.l.bf16 %v143_v20  ;;  %v151_v26 = vld [vmem:[%s541_s3 + $0x10] sm:$0xff]  ;;  %v150_v28 = vld [vmem:[%s541_s3 + $0x8] sm:$0xff] }
  0x13   :  { %305 = vmatpush3.bf16.msra.mxu0 %v360_v16  ;;  %334 = vmatprep.subr.mxu1 %v386_v1  ;;  %v363_v29 = vld [vmem:[%s539_s1] sm:$0xff]   ;;  %s389_s1 = smov [#allocation4]  }
  0x14   :  { %335 = vmatpush3.msra.mxu1 %v155_v17  ;;  %306 = vmatprep.subr.bf16.mxu0 %v386_v1  ;;  %v147_v27 = vmul.f32 %v146_v25, %v144_v22  ;;  %vm145_vm1 = vcmp.gt.f32.partialorder %v144_v22, 0.0  ;;  %v149_v30 = vld [vmem:[%s541_s3] sm:$0xff]  ;;  %s254_s3 = sshll.u32 %s389_s1, 4  ;;  %s255_s3 = int_to_ptr.vmem [resolvable:$true] %s254_s3 }
  0x15   :  { %336 = vmatprep.subr.mxu1 %v386_v1  ;;  %v32_v32 = vld [vmem:[%s538_s0] sm:$0xf]  ;;  %s364_s0 = scalar_lea.vmem %s255_s3, 128  ;;  %p369_p1 = scmp.lt.s32.totalorder %s255_s3, %s255_s3 }
  0x16   :  { %337 = vmatpush3.msra.mxu1 %v154_v18  ;;  %v148_v31 = vsel %vm145_vm1, %v144_v22, %v147_v27  ;;  %p365_p0 = scmp.ne.s32.totalorder %s255_s3, %s364_s0  ;;  %p370_p2 = scmp.lt.s32.totalorder %s364_s0, %s364_s0 }
  0x17   :  { %307 = vmatpush3.bf16.msra.mxu0 %v361_v19  ;;  %338 = vmatprep.subr.mxu1 %v386_v1 }
  0x18   :  { %339 = vmatpush3.msra.mxu1 %v153_v21  ;;  %308 = vmatprep.subr.bf16.mxu0 %v386_v1  ;;  %p371_p3 = por %p370_p2, %p369_p1 }
  0x19   :  { %340 = vmatprep.subr.mxu1 %v386_v1 }
  0x1a   :  { %341 = vmatpush3.msra.mxu1 %v152_v23  ;;  %p372_p4 = pnand %p371_p3, %p365_p0 }
  0x1b   :  { %309 = vmatpush3.bf16.msra.mxu0 %v362_v24  ;;  %342 = vmatprep.subr.mxu1 %v386_v1 }
  0x1c   :  { %343 = vmatpush3.msra.mxu1 %v151_v26  ;;  %310 = vmatprep.subr.bf16.mxu0 %v386_v1 }
  0x1d   :  { %344 = vmatprep.subr.mxu1 %v386_v1 }
  0x1e   :  { %345 = vmatpush3.msra.mxu1 %v150_v28 }
  0x1f   :  { %311 = vmatpush3.bf16.msra.mxu0 %v363_v29  ;;  %346 = vmatprep.subr.mxu1 %v386_v1 }
  0x20   :  { %347 = vmatpush3.msra.mxu1 %v149_v30 }
  0x21   :  { %349 = vmatmul.mubr.f32.vlgmr.msra.gmra.mxu1 %v148_v31 }
  0x22   :  { %313 = vmatmul.mubr.bf16.vlgmr.msra.gmra.mxu0 %v32_v32 }
  0x8c   :  { %v241_v35 = vpop.permute.xlu0 %240 }
  0xe1   :  { %v231_v33 = vpop.f32.mrf.mxu1 }
  0xe2   :  { %v131_v34 = vpop.f32.mrf.mxu0 }
  0xe3   :  { %v236_v36 = vadd.f32 %v231_v33, %v131_v34  ;;  %v350_v37 = vpop.f32.mrf.mxu1 }
  0xe4   :  { %v314_v38 = vpop.f32.mrf.mxu0 }
  0xe5   :  { %v243_v39 = vmul.f32 %v241_v35, %v236_v36 }
  0xe6   :  { %v134_v40 = vpop.f32.mrf.mxu0 }
  0xe7   :  { %v245_v41 = vmul.f32 %v243_v39, %v146_v25  ;;  %vm244_vm2 = vcmp.gt.f32.partialorder %v243_v39, 0.0 }
  0xe8   :  { %v315_v42 = vpop.f32.mrf.mxu0 }
  0xe9   :  { %v246_v43 = vsel %vm244_vm2, %v243_v39, %v245_v41 }
  0xea   :  { %247 = vst [vmem:[#allocation4] sm:$0xff] %v246_v43 }
  0xeb   :  { %375 = shalt.err (!%p372_p4)
}
  0xec   :  { %257 = dma.vmem_to_hbm [thread:$0]  %s255_s3, 128, %s544_s6, [#allocation5]  }
  0xed   :  { %384 = dma.done.wait [#allocation5], 128  }
  0xee   :  { %385 = vsyncadd [#allocation5], 4294967168 }
  0xef   :  { %261 = vsyncpa [#allocation5], 1 }

</bundles_post_ra>
